<compile_context>
chip_gen: v7x
topology: tpu7x:2x2x1
jax: 0.10.0
libtpu: 0.0.40
codegen_flags: <defaults>
</compile_context>

<pallas_src>
import jax
import jax.numpy as jnp
from jax.experimental import pallas as pl
from jax.experimental.pallas import tpu as pltpu

HIDDEN_SIZE = 512


def _round_up(n, m):
    return ((n + m - 1) // m) * m


def _qnet_kernel(x_ref, w1_ref, b1_ref, w2_ref, b2_ref, out_ref):
    # x arrives f32; cast to the MXU operand dtype in-kernel (VPU has slack).
    x = x_ref[...].astype(w1_ref.dtype)
    # hidden = relu(x @ W1 + b1); bf16 operands, f32 accumulate.
    h = jnp.dot(x, w1_ref[...], preferred_element_type=jnp.float32)
    h = jnp.maximum(h + b1_ref[...], 0.0)              # f32 elementwise (v5e-safe)
    # out = hidden @ W2 + b2; single cast back to the MXU dtype.
    o = jnp.dot(h.astype(w2_ref.dtype), w2_ref[...],
                preferred_element_type=jnp.float32)
    out_ref[...] = (o + b2_ref[...]).astype(out_ref.dtype)


def prepare_params(w1, b1, w2, b2, *, compute_dtype=jnp.bfloat16):
    """One-time parameter prep (re-run only after optimizer updates).

    Casts weights to the MXU operand dtype and reshapes biases to (1, N) f32.
    No feature padding is required: non-128 feature dims are handled by Mosaic
    (full-extent blocks), so there is no per-call padding work left.
    """
    return (w1.astype(compute_dtype),
            b1.astype(jnp.float32).reshape(1, -1),
            w2.astype(compute_dtype),
            b2.astype(jnp.float32).reshape(1, -1))


def linear_qnet_forward(x, params, *, block_batch=2048, target_steps=4):
    """Forward pass of Linear_QNet.

    x      : (B, in_features) float32
    params : output of prepare_params()
    Returns (B, out_features) float32.
    """
    w1c, b1c, w2c, b2c = params
    B, in_features = x.shape
    hidden = w1c.shape[1]
    out_features = w2c.shape[1]

    # Batch tile: aim for >= target_steps grid steps (so v7x megacore sharding
    # engages), rows a multiple of 8 (sublane), capped at block_batch so
    # double-buffered x/out + the (TB, hidden) temporaries stay well inside the
    # 32 MiB scoped-VMEM limit on all generations (v7x included).
    TB = max(8, min(block_batch, _round_up(pl.cdiv(B, target_steps), 8)))
    Bp = _round_up(B, TB)
    if Bp != B:
        # NOTE: padded (zero) rows still produce relu(b1)@W2 + b2 in the padded
        # output region; they are sliced off below, never read.
        x_in = jnp.zeros((Bp, in_features), x.dtype).at[:B].set(x)
    else:
        x_in = x

    grid = (Bp // TB,)

    param_bytes = (w1c.size * w1c.dtype.itemsize + w2c.size * w2c.dtype.itemsize
                   + b1c.size * b1c.dtype.itemsize + b2c.size * b2c.dtype.itemsize)
    cost = pl.CostEstimate(
        flops=2 * Bp * (in_features * hidden + hidden * out_features),
        transcendentals=0,
        bytes_accessed=(x_in.size * x_in.dtype.itemsize
                        + Bp * out_features * 4
                        + param_bytes),
    )

    out_p = pl.pallas_call(
        _qnet_kernel,
        out_shape=jax.ShapeDtypeStruct((Bp, out_features), jnp.float32),
        grid_spec=pltpu.PrefetchScalarGridSpec(
            num_scalar_prefetch=0,
            grid=grid,
            in_specs=[
                # x: batch-tiled, full (unpadded) feature extent.
                pl.BlockSpec((TB, in_features), lambda i: (i, 0)),
                # Weights / biases: constant index_map -> DMA'd once, VMEM-resident.
                pl.BlockSpec((in_features, hidden), lambda i: (0, 0)),
                pl.BlockSpec((1, hidden), lambda i: (0, 0)),
                pl.BlockSpec((hidden, out_features), lambda i: (0, 0)),
                pl.BlockSpec((1, out_features), lambda i: (0, 0)),
            ],
            # Unpadded output block: last dim equals full array dim.
            out_specs=pl.BlockSpec((TB, out_features), lambda i: (i, 0)),
        ),
        compiler_params=pltpu.CompilerParams(
            dimension_semantics=("parallel",),      # megacore-shard batch (v7x)
            vmem_limit_bytes=32 * 1024 * 1024,      # safe on v5e/v6e/v7x
        ),
        cost_estimate=cost,
    )(x_in, w1c, b1c, w2c, b2c)

    return out_p[:B] if Bp != B else out_p


def init_params(key, input_size, output_size, hidden_size=HIDDEN_SIZE):
    """Deterministic init mimicking PyTorch nn.Linear default (U[-1/sqrt(fan_in), +])."""
    k1, k2, k3, k4 = jax.random.split(key, 4)
    bound1 = 1.0 / jnp.sqrt(jnp.float32(input_size))
    bound2 = 1.0 / jnp.sqrt(jnp.float32(hidden_size))
    # Stored already transposed: (in, hidden) and (hidden, out).
    w1 = jax.random.uniform(k1, (input_size, hidden_size), jnp.float32,
                            -bound1, bound1)
    b1 = jax.random.uniform(k2, (hidden_size,), jnp.float32, -bound1, bound1)
    w2 = jax.random.uniform(k3, (hidden_size, output_size), jnp.float32,
                            -bound2, bound2)
    b2 = jax.random.uniform(k4, (output_size,), jnp.float32, -bound2, bound2)
    return w1, b1, w2, b2


def _reference_f32(x, w1, b1, w2, b2):
    return jnp.maximum(x @ w1 + b1, 0.0) @ w2 + b2


def _reference_bf16(x, w1, b1, w2, b2):
    bf16 = jnp.bfloat16
    h = jnp.maximum(
        jnp.dot(x.astype(bf16), w1.astype(bf16),
                preferred_element_type=jnp.float32) + b1, 0.0)
    return jnp.dot(h.astype(bf16), w2.astype(bf16),
                   preferred_element_type=jnp.float32) + b2


# TODO(synk): save()/load() torch checkpoint I/O is host-side persistence, not a
# kernel concern; omitted.

if __name__ == "__main__":
    key = jax.random.PRNGKey(0)
    kx, kp, kx2 = jax.random.split(key, 3)

    batch = 8
    input_size = 16
    output_size = 4

    w1, b1, w2, b2 = init_params(kp, input_size, output_size)
    params = prepare_params(w1, b1, w2, b2)          # one-time prep

    # --- small-batch run (grid=(1,)) -----------------------------------------
    x = jax.random.normal(kx, (batch, input_size), jnp.float32)
    out = jax.block_until_ready(linear_qnet_forward(x, params))
    assert out.shape == (batch, output_size)
    assert out.dtype == jnp.float32

    ref = _reference_bf16(x, w1, b1, w2, b2)
    assert jnp.allclose(out, ref, atol=2e-2, rtol=2e-2), (
        f"max abs err {jnp.max(jnp.abs(out - ref))}")
    assert jnp.allclose(out, _reference_f32(x, w1, b1, w2, b2),
                        atol=5e-2, rtol=5e-2)

    # --- multi-step grid + batch-padding path (grid=(4,), Bp>B) ---------------
    batch2 = 300
    x2 = jax.random.normal(kx2, (batch2, input_size), jnp.float32)
    out2 = jax.block_until_ready(linear_qnet_forward(x2, params))
    assert out2.shape == (batch2, output_size)
    ref2 = _reference_bf16(x2, w1, b1, w2, b2)
    assert jnp.allclose(out2, ref2, atol=2e-2, rtol=2e-2), (
        f"max abs err {jnp.max(jnp.abs(out2 - ref2))}")

    print("KERNEL_OK")
</pallas_src>

<mosaic_0001>
module attributes {stable_mosaic.version = 11 : i64} {
  func.func @_qnet_kernel(%arg0: i32, %arg1: memref<8x16xf32, #tpu.memory_space<vmem>>, %arg2: memref<16x512xbf16, #tpu.memory_space<vmem>>, %arg3: memref<1x512xf32, #tpu.memory_space<vmem>>, %arg4: memref<512x4xbf16, #tpu.memory_space<vmem>>, %arg5: memref<1x4xf32, #tpu.memory_space<vmem>>, %arg6: memref<8x4xf32, #tpu.memory_space<vmem>>) attributes {dimension_semantics = [#tpu.dimension_semantics<parallel>], iteration_bounds = array<i64: 1>, scalar_prefetch = 0 : i64, scratch_operands = 0 : i64, tpu.core_type = #tpu.core_type<tc>, window_params = [{transform_indices = @transform_0, window_bounds = array<i64: 8, 16>}, {pipeline_mode = #tpu.pipeline_mode<synchronous>, transform_indices = @transform_1, window_bounds = array<i64: 16, 512>}, {pipeline_mode = #tpu.pipeline_mode<synchronous>, transform_indices = @transform_2, window_bounds = array<i64: 1, 512>}, {pipeline_mode = #tpu.pipeline_mode<synchronous>, transform_indices = @transform_3, window_bounds = array<i64: 512, 4>}, {pipeline_mode = #tpu.pipeline_mode<synchronous>, transform_indices = @transform_4, window_bounds = array<i64: 1, 4>}, {transform_indices = @transform_5, window_bounds = array<i64: 8, 4>}]} {
    %c0 = arith.constant 0 : index
    %c0_0 = arith.constant 0 : index
    %0 = vector.load %arg1[%c0, %c0_0] : memref<8x16xf32, #tpu.memory_space<vmem>>, vector<8x16xf32>
    %1 = arith.truncf %0 : vector<8x16xf32> to vector<8x16xbf16>
    %c0_1 = arith.constant 0 : index
    %c0_2 = arith.constant 0 : index
    %2 = vector.load %arg2[%c0_1, %c0_2] : memref<16x512xbf16, #tpu.memory_space<vmem>>, vector<16x512xbf16>
    %cst = arith.constant dense<0.000000e+00> : vector<8x512xf32>
    %3 = tpu.matmul %1, %2, %cst {dimension_numbers = #tpu.dot_dimension_numbers<[1], [0], [0], [1], [0, 0, 1, 1], [], []>} : vector<8x16xbf16>, vector<16x512xbf16>, vector<8x512xf32> -> vector<8x512xf32>
    %c0_3 = arith.constant 0 : index
    %c0_4 = arith.constant 0 : index
    %4 = vector.load %arg3[%c0_3, %c0_4] : memref<1x512xf32, #tpu.memory_space<vmem>>, vector<1x512xf32>
    %5 = vector.broadcast %4 : vector<1x512xf32> to vector<8x512xf32>
    %6 = arith.addf %3, %5 : vector<8x512xf32>
    %cst_5 = arith.constant 0.000000e+00 : f32
    %7 = vector.broadcast %cst_5 : f32 to vector<8x512xf32>
    %8 = arith.maximumf %6, %7 : vector<8x512xf32>
    %9 = arith.truncf %8 : vector<8x512xf32> to vector<8x512xbf16>
    %c0_6 = arith.constant 0 : index
    %c0_7 = arith.constant 0 : index
    %10 = vector.load %arg4[%c0_6, %c0_7] : memref<512x4xbf16, #tpu.memory_space<vmem>>, vector<512x4xbf16>
    %cst_8 = arith.constant dense<0.000000e+00> : vector<8x4xf32>
    %11 = tpu.matmul %9, %10, %cst_8 {dimension_numbers = #tpu.dot_dimension_numbers<[1], [0], [0], [1], [0, 0, 1, 1], [], []>} : vector<8x512xbf16>, vector<512x4xbf16>, vector<8x4xf32> -> vector<8x4xf32>
    %c0_9 = arith.constant 0 : index
    %c0_10 = arith.constant 0 : index
    %12 = vector.load %arg5[%c0_9, %c0_10] : memref<1x4xf32, #tpu.memory_space<vmem>>, vector<1x4xf32>
    %13 = vector.broadcast %12 : vector<1x4xf32> to vector<8x4xf32>
    %14 = arith.addf %11, %13 : vector<8x4xf32>
    %c0_11 = arith.constant 0 : index
    %c0_12 = arith.constant 0 : index
    %15 = vector.load %arg6[%c0_11, %c0_12] : memref<8x4xf32, #tpu.memory_space<vmem>>, vector<8x4xf32>
    tpu.vector_store %arg6[%c0_11, %c0_12], %14 {strides = array<i32>} : memref<8x4xf32, #tpu.memory_space<vmem>>, vector<8x4xf32>,
    return
  }
  func.func @transform_0(%arg0: i32) -> (i32, i32) {
    %c0_i32 = arith.constant 0 : i32
    %c0_i32_0 = arith.constant 0 : i32
    return %arg0, %c0_i32 : i32, i32
  }
  func.func @transform_1(%arg0: i32) -> (i32, i32) {
    %c0_i32 = arith.constant 0 : i32
    %c0_i32_0 = arith.constant 0 : i32
    %c0_i32_1 = arith.constant 0 : i32
    return %c0_i32, %c0_i32_0 : i32, i32
  }
  func.func @transform_2(%arg0: i32) -> (i32, i32) {
    %c0_i32 = arith.constant 0 : i32
    %c0_i32_0 = arith.constant 0 : i32
    %c0_i32_1 = arith.constant 0 : i32
    return %c0_i32, %c0_i32_0 : i32, i32
  }
  func.func @transform_3(%arg0: i32) -> (i32, i32) {
    %c0_i32 = arith.constant 0 : i32
    %c0_i32_0 = arith.constant 0 : i32
    %c0_i32_1 = arith.constant 0 : i32
    return %c0_i32, %c0_i32_0 : i32, i32
  }
  func.func @transform_4(%arg0: i32) -> (i32, i32) {
    %c0_i32 = arith.constant 0 : i32
    %c0_i32_0 = arith.constant 0 : i32
    %c0_i32_1 = arith.constant 0 : i32
    return %c0_i32, %c0_i32_0 : i32, i32
  }
  func.func @transform_5(%arg0: i32) -> (i32, i32) {
    %c0_i32 = arith.constant 0 : i32
    %c0_i32_0 = arith.constant 0 : i32
    return %arg0, %c0_i32 : i32, i32
  }
}

</mosaic_0001>

<bundles_post_ra>
// kernel: tpu_custom_call.1
= control target key start
LH: loop header
LB: loop body
LE: loop exit
PB: predicated region body
PF: predicated region fallthrough
CT: control target
= control target key end

     0   :  { %v634_v1 = vmov 0   ;;  %vm69_vm0 = vcmask 130048   ;;  %v29_v39 = vlaneseq  ;;  %vm506_vm1 = vcmask 31744   ;;  %s785_s1 = inlined_call_operand.vmem [shape: bf16[16,512], index: 1, kind: input, shape index: {}]   ;;  %s786_s0 = inlined_call_operand.vmem [shape: f32[8,16], index: 0, kind: input, shape index: {}]   ;;  %s787_s3 = inlined_call_operand.vmem [shape: bf16[512,4], index: 3, kind: input, shape index: {}]   ;;  %s788_s2 = inlined_call_operand.vmem [shape: f32[1,512], index: 2, kind: input, shape index: {}]   ;;  %s789_s4 = inlined_call_operand.vmem [shape: f32[1,4], index: 4, kind: input, shape index: {}]   ;;  %s790_s5 = inlined_call_operand.vmem [shape: f32[8,4], index: 5, kind: output, shape index: {}]  }
   0x1   :  { %v596_v0 = vld [vmem:[%s785_s1 + $0x4] ss:$16 sps:$4 sm:$0xff]   ;;  %105 = vmatprep.mubr.bf16.mxu0 %v634_v1  ;;  %146 = vmatprep.mubr.bf16.mxu1 %v634_v1  ;;  %v598_v2 = vld [vmem:[%s785_s1 + $0xc] ss:$16 sps:$4 sm:$0xff]   ;;  %v600_v3 = vld [vmem:[%s785_s1] ss:$16 sps:$4 sm:$0xff]  }
   0x2   :  { %73 = vmatprep.subr.bf16.mxu0 %v596_v0  ;;  %v601_v4 = vld [vmem:[%s785_s1 + $0x8] ss:$16 sps:$4 sm:$0xff]   ;;  %v21_v5 = vld [vmem:[%s786_s0] sm:$0xff]  ;;  %114 = vmatprep.subr.bf16.mxu1 %v598_v2  ;;  %v610_v15 = vld [vmem:[%s787_s3 + $0x50] sm:$0xff]   ;;  %v30_v40 = vshrl.u32 %v29_v39, 7 }
   0x3   :  { %v22_v6 = vpack.c.bf16 %v21_v5, %v21_v5  ;;  %v602_v7 = vld [vmem:[%s787_s3 + $0x40] sm:$0xff]   ;;  %74 = vmatpush1.bf16.msra.mxu0 %v600_v3  ;;  %115 = vmatpush1.bf16.msra.mxu1 %v601_v4  ;;  %v606_v11 = vld [vmem:[%s787_s3 + $0x48] sm:$0xff]   ;;  %v611_v16 = vld [vmem:[%s787_s3 + $0xd0] sm:$0xff]  }
   0x4   :  { %v603_v8 = vld [vmem:[%s787_s3 + $0xc0] sm:$0xff]   ;;  %551 = vmatprep.subr.bf16.mxu0 %v602_v7  ;;  %v607_v12 = vld [vmem:[%s787_s3 + $0xc8] sm:$0xff]   ;;  %v612_v17 = vld [vmem:[%s787_s3 + $0x10] sm:$0xff]   ;;  %v31_v41 = vsub.s32 0, %v30_v40  ;;  %v39_v42 = vsub.s32 2, %v30_v40  ;;  %v35_v44 = vsub.s32 1, %v30_v40 }
   0x5   :  { %v604_v9 = vld [vmem:[%s787_s3] sm:$0xff]   ;;  %573 = vmatprep.subr.bf16.mxu1 %v603_v8  ;;  %v608_v13 = vld [vmem:[%s787_s3 + $0x8] sm:$0xff]   ;;  %v613_v18 = vld [vmem:[%s787_s3 + $0x90] sm:$0xff]   ;;  %v43_v45 = vsub.s32 3, %v30_v40 }
   0x6   :  { %v605_v10 = vld [vmem:[%s787_s3 + $0x80] sm:$0xff]   ;;  %516 = vmatmul.mubr.msk.bf16.vlgmr.msra.gmra.mrb[0].mxu0 %vm69_vm0, %v22_v6  ;;  %517 = vmatmul.mubr.msk.bf16.vlgmr.msra.gmra.mrb[0].mxu1 %vm69_vm0, %v22_v6  ;;  %v609_v14 = vld [vmem:[%s787_s3 + $0x88] sm:$0xff]   ;;  %v614_v19 = vld [vmem:[%s787_s3 + $0x58] sm:$0xff]  }
   0x7   :  { %552 = vmatpush3.bf16.msra.mxu0 %v604_v9  ;;  %574 = vmatpush3.bf16.msra.mxu1 %v605_v10  ;;  %v615_v20 = vld [vmem:[%s787_s3 + $0xd8] sm:$0xff]   ;;  %v618_v23 = vld [vmem:[%s787_s3 + $0x60] sm:$0xff]   ;;  %v622_v27 = vld [vmem:[%s787_s3 + $0x68] sm:$0xff]  }
   0x8   :  { %553 = vmatprep.subr.bf16.mxu0 %v606_v11  ;;  %575 = vmatprep.subr.bf16.mxu1 %v607_v12  ;;  %v616_v21 = vld [vmem:[%s787_s3 + $0x18] sm:$0xff]   ;;  %v619_v24 = vld [vmem:[%s787_s3 + $0xe0] sm:$0xff]   ;;  %v623_v28 = vld [vmem:[%s787_s3 + $0xe8] sm:$0xff]  }
   0x9   :  { %v617_v22 = vld [vmem:[%s787_s3 + $0x98] sm:$0xff]   ;;  %v620_v25 = vld [vmem:[%s787_s3 + $0x20] sm:$0xff]   ;;  %v624_v29 = vld [vmem:[%s787_s3 + $0x28] sm:$0xff]  }
   0xa   :  { %v621_v26 = vld [vmem:[%s787_s3 + $0xa0] sm:$0xff]   ;;  %v625_v30 = vld [vmem:[%s787_s3 + $0xa8] sm:$0xff]   ;;  %v626_v31 = vld [vmem:[%s787_s3 + $0x70] sm:$0xff]  }
   0xb   :  { %554 = vmatpush3.bf16.msra.mxu0 %v608_v13  ;;  %576 = vmatpush3.bf16.msra.mxu1 %v609_v14  ;;  %v627_v32 = vld [vmem:[%s787_s3 + $0xf0] sm:$0xff]   ;;  %v630_v35 = vld [vmem:[%s787_s3 + $0x78] sm:$0xff]   ;;  %v27_v43 = vld [vmem:[%s788_s2] sm:$0xf] }
   0xc   :  { %555 = vmatprep.subr.bf16.mxu0 %v610_v15  ;;  %577 = vmatprep.subr.bf16.mxu1 %v611_v16  ;;  %v628_v33 = vld [vmem:[%s787_s3 + $0x30] sm:$0xff]   ;;  %v631_v36 = vld [vmem:[%s787_s3 + $0xf8] sm:$0xff]   ;;  %v32_v46 = vrot.slane %v27_v43, %v31_v41  ;;  %v40_v47 = vrot.slane %v27_v43, %v39_v42  ;;  %v36_v48 = vrot.slane %v27_v43, %v35_v44  ;;  %v518_v8 = vld [vmem:[%s789_s4] ss:$0 sm:$0xff] }
   0xd   :  { %v629_v34 = vld [vmem:[%s787_s3 + $0xb0] sm:$0xff]   ;;  %v632_v37 = vld [vmem:[%s787_s3 + $0x38] sm:$0xff]   ;;  %v44_v49 = vrot.slane %v27_v43, %v43_v45 }
   0xe   :  { %v633_v38 = vld [vmem:[%s787_s3 + $0xb8] sm:$0xff]  }
   0xf   :  { %556 = vmatpush3.bf16.msra.mxu0 %v612_v17  ;;  %578 = vmatpush3.bf16.msra.mxu1 %v613_v18 }
  0x10   :  { %557 = vmatprep.subr.bf16.mxu0 %v614_v19  ;;  %579 = vmatprep.subr.bf16.mxu1 %v615_v20 }
  0x13   :  { %558 = vmatpush3.bf16.msra.mxu0 %v616_v21  ;;  %580 = vmatpush3.bf16.msra.mxu1 %v617_v22 }
  0x14   :  { %559 = vmatprep.subr.bf16.mxu0 %v618_v23  ;;  %581 = vmatprep.subr.bf16.mxu1 %v619_v24 }
  0x17   :  { %560 = vmatpush3.bf16.msra.mxu0 %v620_v25  ;;  %582 = vmatpush3.bf16.msra.mxu1 %v621_v26 }
  0x18   :  { %561 = vmatprep.subr.bf16.mxu0 %v622_v27  ;;  %583 = vmatprep.subr.bf16.mxu1 %v623_v28 }
  0x1b   :  { %562 = vmatpush3.bf16.msra.mxu0 %v624_v29  ;;  %584 = vmatpush3.bf16.msra.mxu1 %v625_v30 }
  0x1c   :  { %563 = vmatprep.subr.bf16.mxu0 %v626_v31  ;;  %585 = vmatprep.subr.bf16.mxu1 %v627_v32 }
  0x1f   :  { %564 = vmatpush3.bf16.msra.mxu0 %v628_v33  ;;  %586 = vmatpush3.bf16.msra.mxu1 %v629_v34 }
  0x20   :  { %565 = vmatprep.subr.bf16.mxu0 %v630_v35  ;;  %587 = vmatprep.subr.bf16.mxu1 %v631_v36 }
  0x23   :  { %566 = vmatpush3.bf16.msra.mxu0 %v632_v37  ;;  %588 = vmatpush3.bf16.msra.mxu1 %v633_v38 }
  0xd9   :  { %v107_v50 = vpop.f32.mrb[0].mxu0  ;;  %v148_v51 = vpop.f32.mrb[0].mxu1 }
  0xda   :  { %v108_v52 = vadd.f32 %v107_v50, %v32_v46  ;;  %v149_v53 = vadd.f32 %v148_v51, %v40_v47  ;;  %v109_v54 = vpop.f32.mrb[1].mxu0  ;;  %v150_v55 = vpop.f32.mrb[1].mxu1 }
  0xdb   :  { %v110_v56 = vadd.f32 %v109_v54, %v36_v48  ;;  %v151_v57 = vadd.f32 %v150_v55, %v44_v49  ;;  %v111_v58 = vpop.f32.mrb[2].mxu0  ;;  %v152_v59 = vpop.f32.mrb[2].mxu1 }
  0xdc   :  { %v155_v60 = vmax.f32 %v108_v52, 0.0  ;;  %v157_v61 = vmax.f32 %v149_v53, 0.0  ;;  %v112_v62 = vpop.f32.mrb[3].mxu0  ;;  %v153_v63 = vpop.f32.mrb[3].mxu1 }
  0xdd   :  { %v156_v0 = vmax.f32 %v110_v56, 0.0  ;;  %v158_v1 = vmax.f32 %v151_v57, 0.0 }
  0xde   :  { %v161_v2 = vpack.c.bf16 %v157_v61, %v157_v61  ;;  %v159_v5 = vpack.c.bf16 %v155_v60, %v155_v60 }
  0xdf   :  { %v160_v3 = vpack.c.bf16 %v156_v0, %v156_v0  ;;  %v162_v4 = vpack.c.bf16 %v158_v1, %v158_v1 }
  0xe1   :  { %458 = vmatprep.mubr.bf16.mxu0 %v160_v3  ;;  %498 = vmatprep.mubr.bf16.mxu1 %v162_v4 }
  0xe2   :  { %459 = vmatmul.mubr.bf16.vlgmr.msra.gmra.mrb[4].mxu0 %v159_v5  ;;  %499 = vmatmul.mubr.bf16.vlgmr.msra.gmra.mrb[4].mxu1 %v161_v2 }
 0x1b5   :  { %v567_v6 = vpop.f32.mrb[4].mxu0  ;;  %v589_v7 = vpop.f32.mrb[4].mxu1 }
 0x1b6   :  { %v568_v9 = vpop.f32.mrb[5].mxu0  ;;  %v590_v10 = vpop.f32.mrb[5].mxu1 }
 0x1b7   :  { %v569_v11 = vadd.f32 %v568_v9, %v567_v6  ;;  %v591_v12 = vadd.f32 %v590_v10, %v589_v7  ;;  %v570_v13 = vpop.f32.mrb[6].mxu0  ;;  %v592_v14 = vpop.f32.mrb[6].mxu1 }
 0x1b8   :  { %v571_v15 = vpop.f32.mrb[7].mxu0  ;;  %v593_v16 = vpop.f32.mrb[7].mxu1 }
 0x1b9   :  { %v461_v17 = vadd.f32 %v569_v11, %v518_v8 }
 0x1bb   :  { %v501_v18 = vadd.f32 %v591_v12, %v461_v17 }
 0x1bd   :  { %507 = vst.msk [vmem:[%s790_s5] sm:$0xff] %vm506_vm1, %v501_v18 }

</bundles_post_ra>
